<compile_context>
chip_gen: v7x
topology: tpu7x:2x2x1
jax: 0.10.0
libtpu: 0.0.40
codegen_flags: <defaults>
</compile_context>

<pallas_src>
import jax
import jax.numpy as jnp
from jax.experimental import pallas as pl
from jax.experimental.pallas import tpu as pltpu

# ---- small, module-consistent hyperparameters -------------------------------
VOCAB = 50
EMB = 32
NUM_FILTERS = 8
NUM_CLASSES = 4
WINDOWS = (3, 4, 5)
BATCH = 2
SEQ = 8

LOUT_MAX = SEQ + max(WINDOWS) - 1          # 12 : longest conv output length
KDIM_MAX = max(WINDOWS) * EMB              # 160: widest im2col contraction
FEAT_DIM = NUM_FILTERS * len(WINDOWS)      # 24 : flattened feature width


# ---- Pallas kernel: gather + im2col conv + relu + max-pool + fused fc --------
def textcnn_kernel(tok_ref, emb_tab_ref, wconv_ref, bconv_ref, wfc_ref, bfc_ref,
                   out_ref, col_ref, feat_ref):
    # Embedding gather as one-hot matmul on the MXU: (B,S,V) @ (V,E) -> (B,S,E)
    onehot = (tok_ref[...] ==
              jax.lax.broadcasted_iota(jnp.int32, (BATCH, SEQ, VOCAB), 2)
              ).astype(jnp.float32)
    emb = jnp.einsum('bsv,ve->bse', onehot, emb_tab_ref[...],
                     preferred_element_type=jnp.float32)        # (B, S, E)

    woff = 0
    for wi, ws in enumerate(WINDOWS):
        lout = SEQ + ws - 1          # PyTorch conv output length (padding=ws-1)
        kdim = ws * EMB

        # im2col: LHS[b, l, k*E + e] = emb[b, l + k - (ws-1), e], zero when OOB.
        # Zero-fill the scratch, then drop the (B,S,E) block at row offset
        # (ws-1-k) into lane group k — the zero rows ARE the conv padding.
        col_ref[...] = jnp.zeros_like(col_ref)
        for k in range(ws):
            r0 = ws - 1 - k
            col_ref[:, r0:r0 + SEQ, k * EMB:(k + 1) * EMB] = emb

        # One MXU matmul per window (K = ws*E = 96/128/160) instead of ws taps.
        conv = jnp.einsum('blp,pf->blf',
                          col_ref[:, :lout, :kdim],
                          wconv_ref[woff:woff + kdim, :],
                          preferred_element_type=jnp.float32)   # (B, lout, F)
        conv = conv + bconv_ref[wi:wi + 1, :]                   # (1, F) bcast

        # ReLU + max-pool over the full (padded) length, write into the
        # window-major slot of the flattened feature scratch.
        feat_ref[:, wi * NUM_FILTERS:(wi + 1) * NUM_FILTERS] = jnp.max(
            jnp.maximum(conv, 0.0), axis=1)                     # (B, F)
        woff += kdim

    # Single fused FC: (B, 3F) @ (3F, C) + bias.
    out_ref[...] = (jnp.dot(feat_ref[...], wfc_ref[...],
                            preferred_element_type=jnp.float32)
                    + bfc_ref[...])


# ---- one-time weight packing (model-load time, not per forward) --------------
def prepare_params(emb_table, conv_ws, conv_bs, fc_w, fc_b):
    # conv weights (ws, E, F) -> flattened im2col form (ws*E, F), all windows
    # stacked into one slab along rows (offsets 0 / 96 / 224).
    wconv = jnp.concatenate(
        [w.reshape(ws * EMB, NUM_FILTERS) for w, ws in zip(conv_ws, WINDOWS)],
        axis=0)                                                  # (384, F)
    bconv = jnp.stack(conv_bs, axis=0)                           # (3, F)

    # PyTorch flatten of cat([(B,F,1)]*3, dim=2) -> (B, 3F) is filter-major,
    # window-minor (index = f*3 + w).  The kernel builds features window-major
    # (index = w*F + f), so permute the fc weight rows to match.
    wfc = (fc_w.T.reshape(NUM_FILTERS, len(WINDOWS), NUM_CLASSES)
           .transpose(1, 0, 2)
           .reshape(FEAT_DIM, NUM_CLASSES))                      # (3F, C)
    bfc = fc_b.reshape(1, NUM_CLASSES)
    return (emb_table.astype(jnp.float32), wconv.astype(jnp.float32),
            bconv.astype(jnp.float32), wfc.astype(jnp.float32),
            bfc.astype(jnp.float32))


# ---- forward wrapper ----------------------------------------------------------
@jax.jit
def textcnn_forward(tokens, params):
    emb_table, wconv, bconv, wfc, bfc = params
    tok3 = tokens.reshape(BATCH, SEQ, 1).astype(jnp.int32)   # lane-broadcast form

    vmem = pl.BlockSpec(memory_space=pltpu.MemorySpace.VMEM)
    return pl.pallas_call(
        textcnn_kernel,
        out_shape=jax.ShapeDtypeStruct((BATCH, NUM_CLASSES), jnp.float32),
        in_specs=[vmem] * 6,
        out_specs=vmem,
        scratch_shapes=[
            pltpu.VMEM((BATCH, LOUT_MAX, KDIM_MAX), jnp.float32),  # im2col LHS
            pltpu.VMEM((BATCH, FEAT_DIM), jnp.float32),            # pooled feats
        ],
    )(tok3, emb_table, wconv, bconv, wfc, bfc)


# ---- pure-JAX reference mirroring the PyTorch forward -------------------------
def reference_forward(tokens, emb_table, conv_ws, conv_bs, fc_w, fc_b):
    emb = emb_table[tokens].astype(jnp.float32)                     # (B, S, E)
    feats = []
    for i, ws in enumerate(WINDOWS):
        pad = ws - 1
        x = jnp.pad(emb, ((0, 0), (pad, pad), (0, 0)))
        lout = SEQ + ws - 1
        conv = jnp.zeros((BATCH, lout, NUM_FILTERS), jnp.float32)
        for k in range(ws):
            conv = conv + jnp.einsum('ble,ef->blf', x[:, k:k + lout, :],
                                     conv_ws[i][k])
        conv = conv + conv_bs[i][None, None, :]
        feats.append(jnp.max(jax.nn.relu(conv), axis=1))            # (B, F)
    feat = jnp.stack(feats, axis=2)                                 # (B, F, 3)
    feat = feat.reshape(BATCH, -1)                                  # (B, 3F)
    return feat @ fc_w.T + fc_b


if __name__ == "__main__":
    key = jax.random.PRNGKey(0)
    ks = jax.random.split(key, 10)

    tokens = jax.random.randint(ks[0], (BATCH, SEQ), 0, VOCAB, dtype=jnp.int32)
    emb_table = 0.1 * jax.random.normal(ks[1], (VOCAB, EMB), jnp.float32)
    conv_ws = [0.1 * jax.random.normal(ks[2 + i], (ws, EMB, NUM_FILTERS),
                                       jnp.float32)
               for i, ws in enumerate(WINDOWS)]
    conv_bs = [0.1 * jax.random.normal(ks[5 + i], (NUM_FILTERS,), jnp.float32)
               for i in range(len(WINDOWS))]
    fc_w = 0.1 * jax.random.normal(ks[8], (NUM_CLASSES, FEAT_DIM), jnp.float32)
    fc_b = 0.1 * jax.random.normal(ks[9], (NUM_CLASSES,), jnp.float32)

    params = prepare_params(emb_table, conv_ws, conv_bs, fc_w, fc_b)

    out = textcnn_forward(tokens, params)
    out = jax.block_until_ready(out)

    ref = reference_forward(tokens, emb_table, conv_ws, conv_bs, fc_w, fc_b)
    assert out.shape == (BATCH, NUM_CLASSES)
    assert jnp.allclose(out, ref, rtol=1e-5, atol=1e-5), (out, ref)

    print("KERNEL_OK")
</pallas_src>

<mosaic_0001>
module attributes {stable_mosaic.version = 11 : i64} {
  func.func @textcnn_kernel(%arg0: memref<2x8x1xi32, #tpu.memory_space<vmem>>, %arg1: memref<50x32xf32, #tpu.memory_space<vmem>>, %arg2: memref<384x8xf32, #tpu.memory_space<vmem>>, %arg3: memref<3x8xf32, #tpu.memory_space<vmem>>, %arg4: memref<24x4xf32, #tpu.memory_space<vmem>>, %arg5: memref<1x4xf32, #tpu.memory_space<vmem>>, %arg6: memref<2x4xf32, #tpu.memory_space<vmem>>, %arg7: memref<2x12x160xf32, #tpu.memory_space<vmem>>, %arg8: memref<2x24xf32, #tpu.memory_space<vmem>>) attributes {dimension_semantics = [], scalar_prefetch = 0 : i64, scratch_operands = 2 : i64, tpu.core_type = #tpu.core_type<tc>} {
    %c0 = arith.constant 0 : index
    %c0_0 = arith.constant 0 : index
    %c0_1 = arith.constant 0 : index
    %0 = vector.load %arg0[%c0, %c0_0, %c0_1] : memref<2x8x1xi32, #tpu.memory_space<vmem>>, vector<2x8x1xi32>
    %1 = tpu.iota {dimensions = array<i32: 2>} : vector<2x8x50xi32>
    %2 = vector.broadcast %0 : vector<2x8x1xi32> to vector<2x8x50xi32>
    %3 = arith.cmpi eq, %2, %1 : vector<2x8x50xi32>
    %4 = arith.extui %3 : vector<2x8x50xi1> to vector<2x8x50xi32>
    %5 = arith.sitofp %4 : vector<2x8x50xi32> to vector<2x8x50xf32>
    %c0_2 = arith.constant 0 : index
    %c0_3 = arith.constant 0 : index
    %6 = vector.load %arg1[%c0_2, %c0_3] : memref<50x32xf32, #tpu.memory_space<vmem>>, vector<50x32xf32>
    "tpu.trace_start"() <{level = 10 : i32, message = "bsv,ve->bse"}> : () -> ()
    %cst = arith.constant dense<0.000000e+00> : vector<2x8x32xf32>
    %7 = tpu.matmul %5, %6, %cst {dimension_numbers = #tpu.dot_dimension_numbers<[2], [0], [0, 1], [1], [0, 0, 0, 1, 1, 1], [], []>} : vector<2x8x50xf32>, vector<50x32xf32>, vector<2x8x32xf32> -> vector<2x8x32xf32>
    %cst_4 = arith.constant 0.000000e+00 : f32
    "tpu.trace_stop"() : () -> ()
    %8 = vector.broadcast %cst_4 : f32 to vector<2x12x160xf32>
    %c0_5 = arith.constant 0 : index
    %c0_6 = arith.constant 0 : index
    %c0_7 = arith.constant 0 : index
    %9 = vector.load %arg7[%c0_5, %c0_6, %c0_7] : memref<2x12x160xf32, #tpu.memory_space<vmem>>, vector<2x12x160xf32>
    tpu.vector_store %arg7[%c0_5, %c0_6, %c0_7], %8 {strides = array<i32>} : memref<2x12x160xf32, #tpu.memory_space<vmem>>, vector<2x12x160xf32>,
    %c0_8 = arith.constant 0 : index
    %c2 = arith.constant 2 : index
    %c0_9 = arith.constant 0 : index
    %10 = vector.load %arg7[%c0_8, %c2, %c0_9] : memref<2x12x160xf32, #tpu.memory_space<vmem>>, vector<2x8x32xf32>
    tpu.vector_store %arg7[%c0_8, %c2, %c0_9], %7 {strides = array<i32>} : memref<2x12x160xf32, #tpu.memory_space<vmem>>, vector<2x8x32xf32>,
    %c0_10 = arith.constant 0 : index
    %c1 = arith.constant 1 : index
    %c32 = arith.constant 32 : index
    %11 = vector.load %arg7[%c0_10, %c1, %c32] : memref<2x12x160xf32, #tpu.memory_space<vmem>>, vector<2x8x32xf32>
    tpu.vector_store %arg7[%c0_10, %c1, %c32], %7 {strides = array<i32>} : memref<2x12x160xf32, #tpu.memory_space<vmem>>, vector<2x8x32xf32>,
    %c0_11 = arith.constant 0 : index
    %c0_12 = arith.constant 0 : index
    %c64 = arith.constant 64 : index
    %12 = vector.load %arg7[%c0_11, %c0_12, %c64] : memref<2x12x160xf32, #tpu.memory_space<vmem>>, vector<2x8x32xf32>
    tpu.vector_store %arg7[%c0_11, %c0_12, %c64], %7 {strides = array<i32>} : memref<2x12x160xf32, #tpu.memory_space<vmem>>, vector<2x8x32xf32>,
    %c0_13 = arith.constant 0 : index
    %c0_14 = arith.constant 0 : index
    %c0_15 = arith.constant 0 : index
    %13 = vector.load %arg7[%c0_13, %c0_14, %c0_15] : memref<2x12x160xf32, #tpu.memory_space<vmem>>, vector<2x10x96xf32>
    %c0_16 = arith.constant 0 : index
    %c0_17 = arith.constant 0 : index
    %14 = vector.load %arg2[%c0_16, %c0_17] : memref<384x8xf32, #tpu.memory_space<vmem>>, vector<96x8xf32>
    "tpu.trace_start"() <{level = 10 : i32, message = "blp,pf->blf"}> : () -> ()
    %cst_18 = arith.constant dense<0.000000e+00> : vector<2x10x8xf32>
    %15 = tpu.matmul %13, %14, %cst_18 {dimension_numbers = #tpu.dot_dimension_numbers<[2], [0], [0, 1], [1], [0, 0, 0, 1, 1, 1], [], []>} : vector<2x10x96xf32>, vector<96x8xf32>, vector<2x10x8xf32> -> vector<2x10x8xf32>
    "tpu.trace_stop"() : () -> ()
    %c0_19 = arith.constant 0 : index
    %c0_20 = arith.constant 0 : index
    %16 = vector.load %arg3[%c0_19, %c0_20] : memref<3x8xf32, #tpu.memory_space<vmem>>, vector<1x8xf32>
    %17 = vector.shape_cast %16 : vector<1x8xf32> to vector<1x1x8xf32>
    %18 = vector.broadcast %17 : vector<1x1x8xf32> to vector<2x10x8xf32>
    %19 = arith.addf %15, %18 : vector<2x10x8xf32>
    %cst_21 = arith.constant 0.000000e+00 : f32
    %20 = vector.broadcast %cst_21 : f32 to vector<2x10x8xf32>
    %21 = arith.maximumf %19, %20 : vector<2x10x8xf32>
    %cst_22 = arith.constant dense<0xFF800000> : vector<2x8xf32>
    %22 = vector.multi_reduction <maximumf>, %21, %cst_22 [1] : vector<2x10x8xf32> to vector<2x8xf32>
    %c0_23 = arith.constant 0 : index
    %c0_24 = arith.constant 0 : index
    %23 = vector.load %arg8[%c0_23, %c0_24] : memref<2x24xf32, #tpu.memory_space<vmem>>, vector<2x8xf32>
    tpu.vector_store %arg8[%c0_23, %c0_24], %22 {strides = array<i32>} : memref<2x24xf32, #tpu.memory_space<vmem>>, vector<2x8xf32>,
    %cst_25 = arith.constant 0.000000e+00 : f32
    %24 = vector.broadcast %cst_25 : f32 to vector<2x12x160xf32>
    %c0_26 = arith.constant 0 : index
    %c0_27 = arith.constant 0 : index
    %c0_28 = arith.constant 0 : index
    %25 = vector.load %arg7[%c0_26, %c0_27, %c0_28] : memref<2x12x160xf32, #tpu.memory_space<vmem>>, vector<2x12x160xf32>
    tpu.vector_store %arg7[%c0_26, %c0_27, %c0_28], %24 {strides = array<i32>} : memref<2x12x160xf32, #tpu.memory_space<vmem>>, vector<2x12x160xf32>,
    %c0_29 = arith.constant 0 : index
    %c3 = arith.constant 3 : index
    %c0_30 = arith.constant 0 : index
    %26 = vector.load %arg7[%c0_29, %c3, %c0_30] : memref<2x12x160xf32, #tpu.memory_space<vmem>>, vector<2x8x32xf32>
    tpu.vector_store %arg7[%c0_29, %c3, %c0_30], %7 {strides = array<i32>} : memref<2x12x160xf32, #tpu.memory_space<vmem>>, vector<2x8x32xf32>,
    %c0_31 = arith.constant 0 : index
    %c2_32 = arith.constant 2 : index
    %c32_33 = arith.constant 32 : index
    %27 = vector.load %arg7[%c0_31, %c2_32, %c32_33] : memref<2x12x160xf32, #tpu.memory_space<vmem>>, vector<2x8x32xf32>
    tpu.vector_store %arg7[%c0_31, %c2_32, %c32_33], %7 {strides = array<i32>} : memref<2x12x160xf32, #tpu.memory_space<vmem>>, vector<2x8x32xf32>,
    %c0_34 = arith.constant 0 : index
    %c1_35 = arith.constant 1 : index
    %c64_36 = arith.constant 64 : index
    %28 = vector.load %arg7[%c0_34, %c1_35, %c64_36] : memref<2x12x160xf32, #tpu.memory_space<vmem>>, vector<2x8x32xf32>
    tpu.vector_store %arg7[%c0_34, %c1_35, %c64_36], %7 {strides = array<i32>} : memref<2x12x160xf32, #tpu.memory_space<vmem>>, vector<2x8x32xf32>,
    %c0_37 = arith.constant 0 : index
    %c0_38 = arith.constant 0 : index
    %c96 = arith.constant 96 : index
    %29 = vector.load %arg7[%c0_37, %c0_38, %c96] : memref<2x12x160xf32, #tpu.memory_space<vmem>>, vector<2x8x32xf32>
    tpu.vector_store %arg7[%c0_37, %c0_38, %c96], %7 {strides = array<i32>} : memref<2x12x160xf32, #tpu.memory_space<vmem>>, vector<2x8x32xf32>,
    %c0_39 = arith.constant 0 : index
    %c0_40 = arith.constant 0 : index
    %c0_41 = arith.constant 0 : index
    %30 = vector.load %arg7[%c0_39, %c0_40, %c0_41] : memref<2x12x160xf32, #tpu.memory_space<vmem>>, vector<2x11x128xf32>
    %c96_42 = arith.constant 96 : index
    %c0_43 = arith.constant 0 : index
    %31 = vector.load %arg2[%c96_42, %c0_43] : memref<384x8xf32, #tpu.memory_space<vmem>>, vector<128x8xf32>
    "tpu.trace_start"() <{level = 10 : i32, message = "blp,pf->blf"}> : () -> ()
    %cst_44 = arith.constant dense<0.000000e+00> : vector<2x11x8xf32>
    %32 = tpu.matmul %30, %31, %cst_44 {dimension_numbers = #tpu.dot_dimension_numbers<[2], [0], [0, 1], [1], [0, 0, 0, 1, 1, 1], [], []>} : vector<2x11x128xf32>, vector<128x8xf32>, vector<2x11x8xf32> -> vector<2x11x8xf32>
    "tpu.trace_stop"() : () -> ()
    %c1_45 = arith.constant 1 : index
    %c0_46 = arith.constant 0 : index
    %33 = vector.load %arg3[%c1_45, %c0_46] : memref<3x8xf32, #tpu.memory_space<vmem>>, vector<1x8xf32>
    %34 = vector.shape_cast %33 : vector<1x8xf32> to vector<1x1x8xf32>
    %35 = vector.broadcast %34 : vector<1x1x8xf32> to vector<2x11x8xf32>
    %36 = arith.addf %32, %35 : vector<2x11x8xf32>
    %cst_47 = arith.constant 0.000000e+00 : f32
    %37 = vector.broadcast %cst_47 : f32 to vector<2x11x8xf32>
    %38 = arith.maximumf %36, %37 : vector<2x11x8xf32>
    %cst_48 = arith.constant dense<0xFF800000> : vector<2x8xf32>
    %39 = vector.multi_reduction <maximumf>, %38, %cst_48 [1] : vector<2x11x8xf32> to vector<2x8xf32>
    %c0_49 = arith.constant 0 : index
    %c8 = arith.constant 8 : index
    %40 = vector.load %arg8[%c0_49, %c8] : memref<2x24xf32, #tpu.memory_space<vmem>>, vector<2x8xf32>
    tpu.vector_store %arg8[%c0_49, %c8], %39 {strides = array<i32>} : memref<2x24xf32, #tpu.memory_space<vmem>>, vector<2x8xf32>,
    %cst_50 = arith.constant 0.000000e+00 : f32
    %41 = vector.broadcast %cst_50 : f32 to vector<2x12x160xf32>
    %c0_51 = arith.constant 0 : index
    %c0_52 = arith.constant 0 : index
    %c0_53 = arith.constant 0 : index
    %42 = vector.load %arg7[%c0_51, %c0_52, %c0_53] : memref<2x12x160xf32, #tpu.memory_space<vmem>>, vector<2x12x160xf32>
    tpu.vector_store %arg7[%c0_51, %c0_52, %c0_53], %41 {strides = array<i32>} : memref<2x12x160xf32, #tpu.memory_space<vmem>>, vector<2x12x160xf32>,
    %c0_54 = arith.constant 0 : index
    %c4 = arith.constant 4 : index
    %c0_55 = arith.constant 0 : index
    %43 = vector.load %arg7[%c0_54, %c4, %c0_55] : memref<2x12x160xf32, #tpu.memory_space<vmem>>, vector<2x8x32xf32>
    tpu.vector_store %arg7[%c0_54, %c4, %c0_55], %7 {strides = array<i32>} : memref<2x12x160xf32, #tpu.memory_space<vmem>>, vector<2x8x32xf32>,
    %c0_56 = arith.constant 0 : index
    %c3_57 = arith.constant 3 : index
    %c32_58 = arith.constant 32 : index
    %44 = vector.load %arg7[%c0_56, %c3_57, %c32_58] : memref<2x12x160xf32, #tpu.memory_space<vmem>>, vector<2x8x32xf32>
    tpu.vector_store %arg7[%c0_56, %c3_57, %c32_58], %7 {strides = array<i32>} : memref<2x12x160xf32, #tpu.memory_space<vmem>>, vector<2x8x32xf32>,
    %c0_59 = arith.constant 0 : index
    %c2_60 = arith.constant 2 : index
    %c64_61 = arith.constant 64 : index
    %45 = vector.load %arg7[%c0_59, %c2_60, %c64_61] : memref<2x12x160xf32, #tpu.memory_space<vmem>>, vector<2x8x32xf32>
    tpu.vector_store %arg7[%c0_59, %c2_60, %c64_61], %7 {strides = array<i32>} : memref<2x12x160xf32, #tpu.memory_space<vmem>>, vector<2x8x32xf32>,
    %c0_62 = arith.constant 0 : index
    %c1_63 = arith.constant 1 : index
    %c96_64 = arith.constant 96 : index
    %46 = vector.load %arg7[%c0_62, %c1_63, %c96_64] : memref<2x12x160xf32, #tpu.memory_space<vmem>>, vector<2x8x32xf32>
    tpu.vector_store %arg7[%c0_62, %c1_63, %c96_64], %7 {strides = array<i32>} : memref<2x12x160xf32, #tpu.memory_space<vmem>>, vector<2x8x32xf32>,
    %c0_65 = arith.constant 0 : index
    %c0_66 = arith.constant 0 : index
    %c128 = arith.constant 128 : index
    %47 = vector.load %arg7[%c0_65, %c0_66, %c128] : memref<2x12x160xf32, #tpu.memory_space<vmem>>, vector<2x8x32xf32>
    tpu.vector_store %arg7[%c0_65, %c0_66, %c128], %7 {strides = array<i32>} : memref<2x12x160xf32, #tpu.memory_space<vmem>>, vector<2x8x32xf32>,
    %c0_67 = arith.constant 0 : index
    %c0_68 = arith.constant 0 : index
    %c0_69 = arith.constant 0 : index
    %48 = vector.load %arg7[%c0_67, %c0_68, %c0_69] : memref<2x12x160xf32, #tpu.memory_space<vmem>>, vector<2x12x160xf32>
    %c224 = arith.constant 224 : index
    %c0_70 = arith.constant 0 : index
    %49 = vector.load %arg2[%c224, %c0_70] : memref<384x8xf32, #tpu.memory_space<vmem>>, vector<160x8xf32>
    "tpu.trace_start"() <{level = 10 : i32, message = "blp,pf->blf"}> : () -> ()
    %cst_71 = arith.constant dense<0.000000e+00> : vector<2x12x8xf32>
    %50 = tpu.matmul %48, %49, %cst_71 {dimension_numbers = #tpu.dot_dimension_numbers<[2], [0], [0, 1], [1], [0, 0, 0, 1, 1, 1], [], []>} : vector<2x12x160xf32>, vector<160x8xf32>, vector<2x12x8xf32> -> vector<2x12x8xf32>
    "tpu.trace_stop"() : () -> ()
    %c2_72 = arith.constant 2 : index
    %c0_73 = arith.constant 0 : index
    %51 = vector.load %arg3[%c2_72, %c0_73] : memref<3x8xf32, #tpu.memory_space<vmem>>, vector<1x8xf32>
    %52 = vector.shape_cast %51 : vector<1x8xf32> to vector<1x1x8xf32>
    %53 = vector.broadcast %52 : vector<1x1x8xf32> to vector<2x12x8xf32>
    %54 = arith.addf %50, %53 : vector<2x12x8xf32>
    %cst_74 = arith.constant 0.000000e+00 : f32
    %55 = vector.broadcast %cst_74 : f32 to vector<2x12x8xf32>
    %56 = arith.maximumf %54, %55 : vector<2x12x8xf32>
    %cst_75 = arith.constant dense<0xFF800000> : vector<2x8xf32>
    %57 = vector.multi_reduction <maximumf>, %56, %cst_75 [1] : vector<2x12x8xf32> to vector<2x8xf32>
    %c0_76 = arith.constant 0 : index
    %c16 = arith.constant 16 : index
    %58 = vector.load %arg8[%c0_76, %c16] : memref<2x24xf32, #tpu.memory_space<vmem>>, vector<2x8xf32>
    tpu.vector_store %arg8[%c0_76, %c16], %57 {strides = array<i32>} : memref<2x24xf32, #tpu.memory_space<vmem>>, vector<2x8xf32>,
    %c0_77 = arith.constant 0 : index
    %c0_78 = arith.constant 0 : index
    %59 = vector.load %arg8[%c0_77, %c0_78] : memref<2x24xf32, #tpu.memory_space<vmem>>, vector<2x24xf32>
    %c0_79 = arith.constant 0 : index
    %c0_80 = arith.constant 0 : index
    %60 = vector.load %arg4[%c0_79, %c0_80] : memref<24x4xf32, #tpu.memory_space<vmem>>, vector<24x4xf32>
    %cst_81 = arith.constant dense<0.000000e+00> : vector<2x4xf32>
    %61 = tpu.matmul %59, %60, %cst_81 {dimension_numbers = #tpu.dot_dimension_numbers<[1], [0], [0], [1], [0, 0, 1, 1], [], []>} : vector<2x24xf32>, vector<24x4xf32>, vector<2x4xf32> -> vector<2x4xf32>
    %c0_82 = arith.constant 0 : index
    %c0_83 = arith.constant 0 : index
    %62 = vector.load %arg5[%c0_82, %c0_83] : memref<1x4xf32, #tpu.memory_space<vmem>>, vector<1x4xf32>
    %63 = vector.broadcast %62 : vector<1x4xf32> to vector<2x4xf32>
    %64 = arith.addf %61, %63 : vector<2x4xf32>
    %c0_84 = arith.constant 0 : index
    %c0_85 = arith.constant 0 : index
    %65 = vector.load %arg6[%c0_84, %c0_85] : memref<2x4xf32, #tpu.memory_space<vmem>>, vector<2x4xf32>
    tpu.vector_store %arg6[%c0_84, %c0_85], %64 {strides = array<i32>} : memref<2x4xf32, #tpu.memory_space<vmem>>, vector<2x4xf32>,
    return
  }
}

</mosaic_0001>

<bundles_post_ra>
// kernel: textcnn_forward.1
= control target key start
LH: loop header
LB: loop body
LE: loop exit
PB: predicated region body
PF: predicated region fallthrough
CT: control target
= control target key end

     0   :  { %v2268_v2 = vmov 0   ;;  %s2922_s0 = inlined_call_operand.vmem [shape: s32[2,8,1], index: 0, kind: input, shape index: {}]   ;;  %s2923_s1 = inlined_call_operand.vmem [shape: f32[50,32], index: 1, kind: input, shape index: {}]   ;;  %s2924_s2 = inlined_call_operand.vmem [shape: f32[384,8], index: 2, kind: input, shape index: {}]   ;;  %s2925_s3 = inlined_call_operand.vmem [shape: f32[3,8], index: 3, kind: input, shape index: {}]   ;;  %s2926_s4 = inlined_call_operand.vmem [shape: f32[24,4], index: 4, kind: input, shape index: {}]   ;;  %s2927_s5 = inlined_call_operand.vmem [shape: f32[1,4], index: 5, kind: input, shape index: {}]   ;;  %s2928_s6 = inlined_call_operand.hbm [shape: f32[2,4], index: 6, kind: output, shape index: {}]  }
   0x1   :  { %v24_v0 = vld [vmem:[%s2922_s0] sm:$0xff]  ;;  %2235 = vset.pattern.permute.xlu0 %v2268_v2  ;;  %v41_v3 = vld [vmem:[%s2923_s1 + $0x8] sm:$0xff]  ;;  %v42_v4 = vld [vmem:[%s2923_s1 + $0x10] sm:$0xff] }
   0x2   :  { %v40_v1 = vld [vmem:[%s2923_s1] sm:$0xff]  ;;  %v43_v5 = vld [vmem:[%s2923_s1 + $0x18] sm:$0xff]  ;;  %29 = vperm.xlu0 %2235, %v24_v0  }
   0x3   :  { %v2136_v6 = vpack.c.bf16 %v41_v3, %v40_v1  ;;  %v2140_v7 = vpack.c.bf16 %v43_v5, %v42_v4 }
   0x4   :  { %11 = vsyncpa [#allocation5], 0  ;;  %v25_v8 = vld [vmem:[%s2922_s0 + $0x8] sm:$0xff]  ;;  %v44_v9 = vld [vmem:[%s2923_s1 + $0x20] sm:$0xff]  ;;  %v2269_v11 = vmov 0.0   ;;  %vm54_vm0 = vcmask 1041408   ;;  %v26_v14 = vlaneseq }
   0x5   :  { %v45_v10 = vld [vmem:[%s2923_s1 + $0x28] sm:$0xff]  ;;  %2137 = vmatprep.subr.bf16.mxu0 %v2136_v6  ;;  %133 = vst [vmem:[#allocation2] sm:$0xff] %v2269_v11  ;;  %136 = vst [vmem:[#allocation2 + $0x10] sm:$0xf] %v2269_v11  ;;  %v46_v13 = vld [vmem:[%s2923_s1 + $0x30] sm:$0x3] }
   0x6   :  { %139 = vst [vmem:[#allocation2 + $0x20] sm:$0xff] %v2269_v11  ;;  %141 = vst [vmem:[#allocation2 + $0x30] sm:$0xf] %v2269_v11  ;;  %2139 = vmatpush3.bf16.msra.mxu0 %v2136_v6  ;;  %32 = vperm.xlu0 %2235, %v25_v8   ;;  %v2144_v12 = vpack.c.bf16 %v45_v10, %v44_v9  ;;  %v27_v15 = vand.u32 127, %v26_v14  ;;  %vm47_vm1 = vcmask 408576   ;;  %vm134_vm4 = vcmask 261120  }
   0x7   :  { %2141 = vmatprep.subr.bf16.mxu0 %v2140_v7  ;;  %140 = vst.msk [vmem:[#allocation2 + $0x28] sm:$0xff] %vm134_vm4, %v2269_v11  ;;  %135 = vst.msk [vmem:[#allocation2 + $0x8] sm:$0xff] %vm134_vm4, %v2269_v11  ;;  %vm137_vm5 = vcmask 257024   ;;  %v182_v20 = vld [vmem:[%s2924_s2] sm:$0xff]  ;;  %v183_v21 = vld [vmem:[%s2924_s2 + $0x8] sm:$0xff]  ;;  %v2270_v23 = vmov 0.0|0.0  }
   0x8   :  { %601 = vst.msk [vmem:[#allocation2 + $0x28] sm:$0xff] %vm134_vm4, %v2269_v11  ;;  %597 = vst.msk [vmem:[#allocation2 + $0x8] sm:$0xff] %vm134_vm4, %v2269_v11  ;;  %v2149_v22 = vpack.c.bf16 %v183_v21, %v182_v20  ;;  %2148 = vmatprep.subr.bf16.mxu1 %v2270_v23  ;;  %v184_v24 = vld [vmem:[%s2924_s2 + $0x10] sm:$0xff]  ;;  %v185_v25 = vld [vmem:[%s2924_s2 + $0x18] sm:$0xff]  ;;  %vm149_vm6 = vcmask 261122   ;;  %vm151_vm7 = vcmask 254976  }
   0x9   :  { %138 = vst.msk [vmem:[#allocation2 + $0x18] sm:$0xf] %vm137_vm5, %v2269_v11  ;;  %142 = vst.msk [vmem:[#allocation2 + $0x38] sm:$0xf] %vm137_vm5, %v2269_v11  ;;  %v2152_v26 = vpack.c.bf16 %v185_v25, %v184_v24  ;;  %v186_v27 = vld [vmem:[%s2924_s2 + $0x20] sm:$0xff]  ;;  %v187_v28 = vld [vmem:[%s2924_s2 + $0x28] sm:$0xff] }
   0xa   :  { %2143 = vmatpush3.bf16.msra.mxu0 %v2140_v7  ;;  %1610 = vst.msk [vmem:[#allocation2 + $0x28] sm:$0xff] %vm134_vm4, %v2269_v11  ;;  %1606 = vst.msk [vmem:[#allocation2 + $0x8] sm:$0xff] %vm134_vm4, %v2269_v11  ;;  %2150 = vmatpush3.bf16.msra.mxu1 %v2149_v22  ;;  %v2155_v29 = vpack.c.bf16 %v187_v28, %v186_v27  ;;  %v651_v30 = vld [vmem:[%s2924_s2 + $0x60] sm:$0xff]  ;;  %v652_v31 = vld [vmem:[%s2924_s2 + $0x68] sm:$0xff]  ;;  %s2271_s9 = smov 32   ;;  %s2272_s16 = smov 64  }
   0xb   :  { %2145 = vmatprep.subr.bf16.mxu0 %v2144_v12  ;;  %603 = vst.msk [vmem:[#allocation2 + $0x38] sm:$0xf] %vm137_vm5, %v2269_v11  ;;  %599 = vst.msk [vmem:[#allocation2 + $0x18] sm:$0xf] %vm137_vm5, %v2269_v11  ;;  %2151 = vmatprep.subr.bf16.mxu1 %v2270_v23  ;;  %v2167_v33 = vpack.c.bf16 %v652_v31, %v651_v30  ;;  %v188_v34 = vld [vmem:[%s2924_s2 + $0x30] sm:$0xff]  ;;  %v189_v35 = vld [vmem:[%s2924_s2 + $0x38] sm:$0xff] }
   0xc   :  { %1612 = vst.msk [vmem:[#allocation2 + $0x38] sm:$0xf] %vm137_vm5, %v2269_v11  ;;  %1608 = vst.msk [vmem:[#allocation2 + $0x18] sm:$0xf] %vm137_vm5, %v2269_v11  ;;  %v2158_v41 = vpack.c.bf16 %v189_v35, %v188_v34  ;;  %v653_v42 = vld [vmem:[%s2924_s2 + $0x70] sm:$0xff]  ;;  %v654_v43 = vld [vmem:[%s2924_s2 + $0x78] sm:$0xff] }
   0xd   :  { %v2170_v44 = vpack.c.bf16 %v654_v43, %v653_v42  ;;  %v190_v45 = vld [vmem:[%s2924_s2 + $0x40] sm:$0xff]  ;;  %v191_v46 = vld [vmem:[%s2924_s2 + $0x48] sm:$0xff]  ;;  %v192_v51 = vld [vmem:[%s2924_s2 + $0x50] sm:$0xff]  ;;  %s2273_s25 = smov 96   ;;  %vm2274_vm8 = vmmov 0   ;;  %vm163_vm9 = vcmask 523521  }
   0xe   :  { %2147 = vmatpush3.bf16.msra.mxu0 %v2144_v12  ;;  %2153 = vmatpush3.bf16.msra.mxu1 %v2152_v26  ;;  %v2161_v47 = vpack.c.bf16 %v191_v46, %v190_v45  ;;  %v655_v48 = vld [vmem:[%s2924_s2 + $0x80] sm:$0xff]  ;;  %v656_v49 = vld [vmem:[%s2924_s2 + $0x88] sm:$0xff]  ;;  %v193_v52 = vld [vmem:[%s2924_s2 + $0x58] sm:$0xff]  ;;  %vm165_vm10 = vcmask 516352   ;;  %v2275_v9 = vmov 1983009808  }
   0xf   :  { %2048 = vmatprep.subr.msk.mxu0 %vm54_vm0, %v46_v13  ;;  %2154 = vmatprep.subr.bf16.mxu1 %v2270_v23  ;;  %v2173_v50 = vpack.c.bf16 %v656_v49, %v655_v48  ;;  %v2164_v53 = vpack.c.bf16 %v193_v52, %v192_v51  ;;  %v657_v54 = vld [vmem:[%s2924_s2 + $0x90] sm:$0xff]  ;;  %v658_v55 = vld [vmem:[%s2924_s2 + $0x98] sm:$0xff]  ;;  %v659_v57 = vld [vmem:[%s2924_s2 + $0xa0] sm:$0xff]  ;;  %v205_v10 = vunpack.c.l.s4 %v2275_v9  ;;  %vm175_vm11 = vcmask 785920   ;;  %s2277_s19 = smov 16   ;;  %s2278_s20 = smov 8  }
  0x10   :  { %v2176_v56 = vpack.c.bf16 %v658_v55, %v657_v54  ;;  %2077 = vmatprep.mubr.msk.f32.mxu1 %vm2274_vm8, %v2269_v11  ;;  %v660_v58 = vld [vmem:[%s2924_s2 + $0xa8] sm:$0xff]  ;;  %v661_v61 = vld [vmem:[%s2924_s2 + $0xb0] sm:$0xff]  ;;  %v662_v62 = vld [vmem:[%s2924_s2 + $0xb8] sm:$0xff]  ;;  %vm610_vm12 = vcmask 256000   ;;  %vm622_vm13 = vcmask 517376   ;;  %vm634_vm14 = vcmask 778752  }
  0x11   :  { %v2179_v60 = vpack.c.bf16 %v660_v58, %v659_v57  ;;  %v2182_v0 = vpack.c.bf16 %v662_v62, %v661_v61  ;;  %v663_v1 = vld [vmem:[%s2924_s2 + $0xc0] sm:$0xff]  ;;  %v664_v2 = vld [vmem:[%s2924_s2 + $0xc8] sm:$0xff]  ;;  %v665_v4 = vld [vmem:[%s2924_s2 + $0xd0] sm:$0xff]  ;;  %vm608_vm15 = vcmask 261123   ;;  %s2279_s21 = smov [#allocation4]  }
  0x12   :  { %2049 = vmatpush3.msk.msra.mxu0 %vm54_vm0, %v46_v13  ;;  %2156 = vmatpush3.bf16.msra.mxu1 %v2155_v29  ;;  %v2185_v3 = vpack.c.bf16 %v664_v2, %v663_v1  ;;  %v666_v5 = vld [vmem:[%s2924_s2 + $0xd8] sm:$0xff]  ;;  %vm620_vm0 = vcmask 523522   ;;  %v1668_v45 = vld [vmem:[%s2924_s2 + $0xe0] sm:$0xff]  ;;  %v1669_v46 = vld [vmem:[%s2924_s2 + $0xe8] sm:$0xff]  ;;  %s1953_s22 = sshll.u32 %s2279_s21, 4  ;;  %s1954_s22 = int_to_ptr.vmem [resolvable:$true] %s1953_s22 }
  0x13   :  { %2166 = vmatprep.subr.bf16.mxu0 %v2270_v23  ;;  %2157 = vmatprep.subr.bf16.mxu1 %v2270_v23  ;;  %v2188_v6 = vpack.c.bf16 %v666_v5, %v665_v4  ;;  %v1670_v57 = vld [vmem:[%s2924_s2 + $0xf0] sm:$0xff]  ;;  %v1671_v61 = vld [vmem:[%s2924_s2 + $0xf8] sm:$0xff]  ;;  %v2604_v62 = vld [vmem:[%s2924_s2 + $0x100] sm:$0xff]  ;;  %s2244_s23 = scalar_lea.vmem %s1954_s22, 32  ;;  %p2249_p1 = scmp.lt.s32.totalorder %s1954_s22, %s1954_s22 }
  0x14   :  { %v2617_v2 = vld [vmem:[%s2924_s2 + $0x110] sm:$0xff]  ;;  %p2245_p0 = scmp.ne.s32.totalorder %s1954_s22, %s2244_s23  ;;  %p2250_p2 = scmp.lt.s32.totalorder %s2244_s23, %s2244_s23 }
  0x16   :  { %2159 = vmatpush3.bf16.msra.mxu1 %v2158_v41  ;;  %p2251_p3 = por %p2250_p2, %p2249_p1 }
  0x17   :  { %2160 = vmatprep.subr.bf16.mxu1 %v2270_v23 }
  0x18   :  { %p2252_p4 = pnand %p2251_p3, %p2245_p0 }
  0x1a   :  { %2162 = vmatpush3.bf16.msra.mxu1 %v2161_v47 }
  0x1b   :  { %2163 = vmatprep.subr.bf16.mxu1 %v2270_v23 }
  0x1e   :  { %2165 = vmatpush3.bf16.msra.mxu1 %v2164_v53 }
  0x1f   :  { %2190 = vmatprep.subr.bf16.mxu1 %v2270_v23 }
  0x81   :  { %v30_v16 = vpop.permute.xlu0 %29 }
  0x82   :  { %vm34_vm2 = vcmp.eq.s32.totalorder %v30_v16, %v27_v15  ;;  %v208_v16 = vshrl.u32 %v26_v14, 7  ;;  %v2276_v14 = vmov 1966171168  }
  0x83   :  { %v1961_v17 = vsel %vm34_vm2, 1.0, %v2269_v11  ;;  %v678_v22 = vunpack.c.l.s4 %v2276_v14  ;;  %vm644_vm2 = vcmask 1048320  }
  0x84   :  { %2050 = vmatprep.mubr.msk.f32.mxu0 %vm47_vm1, %v1961_v17 }
  0x85   :  { %v33_v18 = vpop.permute.xlu0 %32  ;;  %v679_v29 = vunpack.c.0.s8 %v678_v22 }
  0x86   :  { %vm35_vm3 = vcmp.eq.s32.totalorder %v33_v18, %v27_v15  ;;  %v206_v15 = vunpack.c.0.s8 %v205_v10  ;;  %v2194_v10 = vpack.c.bf16 %v1671_v61, %v1670_v57 }
  0x87   :  { %v1962_v19 = vsel %vm35_vm3, 1.0, %v2269_v11  ;;  %v2574_v41 = vsub.s32 %v679_v29, %v208_v16  ;;  %vm1630_vm3 = vcmask 518400  }
  0x88   :  { %2051 = vmatmul.mubr.msk.f32.vlgmr.msra.gmra.mrb[0].mxu0 %vm47_vm1, %v1962_v19  ;;  %v2550_v21 = vsub.s32 %v206_v15, %v208_v16  ;;  %vm632_vm1 = vcmask 785921  }
  0x89   :  { %2168 = vmatpush3.bf16.msra.mxu0 %v2167_v33  ;;  %2118 = vmatprep.mubr.msk.f32.mxu0 %vm2274_vm8, %v2269_v11 }
  0x8a   :  { %2169 = vmatprep.subr.bf16.mxu0 %v2270_v23 }
  0x8d   :  { %2171 = vmatpush3.bf16.msra.mxu0 %v2170_v44 }
  0x8e   :  { %2172 = vmatprep.subr.bf16.mxu0 %v2270_v23 }
  0x91   :  { %2174 = vmatpush3.bf16.msra.mxu0 %v2173_v50 }
  0x92   :  { %2175 = vmatprep.subr.bf16.mxu0 %v2270_v23 }
  0x95   :  { %2177 = vmatpush3.bf16.msra.mxu0 %v2176_v56 }
  0x96   :  { %2178 = vmatprep.subr.bf16.mxu0 %v2270_v23 }
  0x99   :  { %2180 = vmatpush3.bf16.msra.mxu0 %v2179_v60 }
  0x9a   :  { %2181 = vmatprep.subr.bf16.mxu0 %v2270_v23 }
  0x9d   :  { %2183 = vmatpush3.bf16.msra.mxu0 %v2182_v0 }
  0x9e   :  { %2184 = vmatprep.subr.bf16.mxu0 %v2270_v23 }
  0xa1   :  { %2186 = vmatpush3.bf16.msra.mxu0 %v2185_v3  ;;  %v2622_v3 = vld [vmem:[%s2924_s2 + $0x118] sm:$0xff] }
  0xa2   :  { %2187 = vmatprep.subr.bf16.mxu0 %v2270_v23 }
  0xa5   :  { %2189 = vmatpush3.bf16.msra.mxu0 %v2188_v6 }
  0xa6   :  { %2220 = vmatprep.subr.bf16.mxu0 %v2270_v23 }
 0x15b   :  { %v2401_v32 = vpop.f32.mrb[0].mxu0 }
 0x15c   :  { %1659 = vst.msk [vmem:[#allocation2 + $0x28] sm:$0xff] %vm134_vm4, %v2401_v32  ;;  %v2412_v36 = vpop.f32.mrb[1].mxu0  ;;  %v2415_v37 = vrot.slane %v2401_v32, 7  ;;  %v2418_v38 = vrot.slane %v2401_v32, 6  ;;  %v2497_v59 = vrot.slane %v2401_v32, 5  ;;  %v1614_v58 = vrot.slane %v2401_v32, 4 }
 0x15d   :  { %1658 = vst.msk [vmem:[#allocation2 + $0x8] sm:$0xff] %vm134_vm4, %v2412_v36  ;;  %v2423_v39 = vrot.slane %v2412_v36, 7  ;;  %v2426_v40 = vrot.slane %v2412_v36, 6  ;;  %v2513_v63 = vrot.slane %v2412_v36, 5  ;;  %v1613_v48 = vrot.slane %v2412_v36, 4 }
 0x15e   :  { %159 = vrot.lane.b32.xlu0 %v2415_v37, %s2271_s9  ;;  %153 = vst.msk [vmem:[#allocation2 + $0x20] sm:$0xfc] %vm149_vm6, %v2418_v38 }
 0x15f   :  { %154 = vst.msk [vmem:[#allocation2 + $0x30] sm:$0x3] %vm151_vm7, %v2418_v38  ;;  %157 = vrot.lane.b32.xlu1 %v2423_v39, %s2271_s9  ;;  %152 = vst.msk [vmem:[#allocation2 + $0x10] sm:$0x3] %vm151_vm7, %v2426_v40  ;;  %vm356_vm7 = vcmask 785408  }
 0x160   :  { %150 = vst.msk [vmem:[#allocation2] sm:$0xfc] %vm149_vm6, %v2426_v40  ;;  %vm1642_vm6 = vcmask 779776  }
 0x162   :  { %614 = vrot.lane.b32.xlu0 %v2426_v40, %s2271_s9 }
 0x163   :  { %169 = vrot.lane.b32.xlu1 %v2412_v36, %s2272_s16 }
 0x166   :  { %638 = vrot.lane.b32.xlu0 %v2412_v36, %s2273_s25  ;;  %v2191_v36 = vpack.c.bf16 %v1669_v46, %v1668_v45 }
 0x167   :  { %171 = vrot.lane.b32.xlu1 %v2401_v32, %s2272_s16 }
 0x16a   :  { %628 = vrot.lane.b32.xlu0 %v2415_v37, %s2272_s16 }
 0x16b   :  { %626 = vrot.lane.b32.xlu1 %v2423_v39, %s2272_s16 }
 0x16e   :  { %1624 = vrot.lane.b32.xlu0 %v2497_v59, %s2271_s9 }
 0x16f   :  { %616 = vrot.lane.b32.xlu1 %v2418_v38, %s2271_s9 }
 0x172   :  { %1622 = vrot.lane.b32.xlu0 %v2513_v63, %s2271_s9 }
 0x173   :  { %640 = vrot.lane.b32.xlu1 %v2401_v32, %s2273_s25 }
 0x176   :  { %1636 = vrot.lane.b32.xlu0 %v2418_v38, %s2272_s16 }
 0x177   :  { %1634 = vrot.lane.b32.xlu1 %v2426_v40, %s2272_s16 }
 0x17b   :  { %1646 = vrot.lane.b32.xlu1 %v2423_v39, %s2273_s25 }
 0x17f   :  { %1648 = vrot.lane.b32.xlu1 %v2415_v37, %s2273_s25 }
 0x1d0   :  { %v160_v7 = vpop.permute.xlu0 %159 }
 0x1d1   :  { %167 = vst.msk [vmem:[#allocation2 + $0x20] sm:$0xfe] %vm163_vm9, %v160_v7  ;;  %v158_v8 = vpop.permute.xlu1 %157 }
 0x1d2   :  { %168 = vst.msk [vmem:[#allocation2 + $0x30] sm:$0x1] %vm165_vm10, %v160_v7  ;;  %166 = vst.msk [vmem:[#allocation2 + $0x10] sm:$0x1] %vm165_vm10, %v158_v8  ;;  %vm1628_vm10 = vcmask 523523  }
 0x1d3   :  { %164 = vst.msk [vmem:[#allocation2] sm:$0xfe] %vm163_vm9, %v158_v8  ;;  %vm1617_vm9 = vcmask 261124  }
 0x1d4   :  { %v615_v12 = vpop.permute.xlu0 %614 }
 0x1d5   :  { %v170_v13 = vpop.permute.xlu1 %169 }
 0x1d6   :  { %176 = vst.msk [vmem:[#allocation2] sm:$0xff] %vm175_vm11, %v170_v13 }
 0x1d8   :  { %v639_v18 = vpop.permute.xlu0 %638 }
 0x1d9   :  { %v2545_v17 = vld.sshfl [vmem:[#allocation2 + $0x30] sm:$0x3 pattern:$0x76325410]  ;;  %v172_v20 = vpop.permute.xlu1 %171 }
 0x1da   :  { %602 = vst [vmem:[#allocation2 + $0x30] sm:$0xf] %v2269_v11  ;;  %v2548_v19 = vld.sshfl [vmem:[#allocation2 + $0x10] sm:$0x3 pattern:$0x76325410] }
 0x1db   :  { %598 = vst [vmem:[#allocation2 + $0x10] sm:$0xf] %v2269_v11  ;;  %613 = vst.msk [vmem:[#allocation2 + $0x30] sm:$0x7] %vm610_vm12, %v2497_v59 }
 0x1dc   :  { %177 = vst.msk [vmem:[#allocation2 + $0x20] sm:$0xff] %vm175_vm11, %v172_v20  ;;  %v629_v24 = vpop.permute.xlu0 %628  ;;  %vm1640_vm11 = vcmask 785922  }
 0x1dd   :  { %611 = vst.msk [vmem:[#allocation2 + $0x10] sm:$0x7] %vm610_vm12, %v2513_v63  ;;  %v178_v25 = vld [vmem:[#allocation2] sm:$0xff]  ;;  %v627_v26 = vpop.permute.xlu1 %626  ;;  %vm1652_vm12 = vcmask 1048321  }
 0x1de   :  { %623 = vst.msk [vmem:[#allocation2 + $0x10] sm:$0x3] %vm622_vm13, %v615_v12  ;;  %v203_v27 = vcombine.high %v178_v25, %v178_v25  ;;  %v210_v28 = vrot.slane %v178_v25, %v2550_v21  ;;  %596 = vst [vmem:[#allocation2] sm:$0xff] %v2269_v11 }
 0x1df   :  { %635 = vst.msk [vmem:[#allocation2 + $0x10] sm:$0x1] %vm634_vm14, %v627_v26 }
 0x1e0   :  { %609 = vst.msk [vmem:[#allocation2] sm:$0xf8] %vm608_vm15, %v2513_v63  ;;  %v217_v30 = vrot.slane %v203_v27, %v2550_v21  ;;  %v218_v31 = vcombine.high %v210_v28, %v210_v28  ;;  %v2565_v34 = vpop.permute.xlu0 %1624  ;;  %v2609_v63 = vld [vmem:[%s2924_s2 + $0x108] sm:$0xff] }
 0x1e1   :  { %621 = vst.msk [vmem:[#allocation2] sm:$0xfc] %vm620_vm0, %v615_v12  ;;  %v617_v35 = vpop.permute.xlu1 %616  ;;  %v2197_v12 = vpack.c.bf16 %v2609_v63, %v2604_v62 }
 0x1e2   :  { %633 = vst.msk [vmem:[#allocation2] sm:$0xfe] %vm632_vm1, %v627_v26  ;;  %v219_v39 = vcombine.high %v217_v30, %v217_v30  ;;  %v269_v40 = vcombine.low %v210_v28, %v218_v31 }
 0x1e3   :  { %v180_v33 = vld [vmem:[#allocation2 + $0x20] sm:$0xff]  ;;  %645 = vst.msk [vmem:[#allocation2] sm:$0xff] %vm644_vm2, %v639_v18 }
 0x1e4   :  { %v227_v37 = vcombine.high %v180_v33, %v180_v33  ;;  %v234_v38 = vrot.slane %v180_v33, %v2550_v21  ;;  %600 = vst [vmem:[#allocation2 + $0x20] sm:$0xff] %v2269_v11  ;;  %625 = vst.msk [vmem:[#allocation2 + $0x30] sm:$0x3] %vm622_vm13, %v617_v35  ;;  %v270_v44 = vcombine.low %v217_v30, %v219_v39  ;;  %v1623_v56 = vpop.permute.xlu0 %1622  ;;  %vm1654_vm13 = vcmask 1041152  }
 0x1e5   :  { %612 = vst.msk [vmem:[#allocation2 + $0x20] sm:$0xf8] %vm608_vm15, %v2497_v59  ;;  %v641_v49 = vpop.permute.xlu1 %640  ;;  %v277_v50 = vrot.slane %v269_v40, %v2550_v21  ;;  %vm592_vm15 = vcmask 1041409  }
 0x1e6   :  { %637 = vst.msk [vmem:[#allocation2 + $0x30] sm:$0x1] %vm634_vm14, %v629_v24  ;;  %v241_v42 = vrot.slane %v227_v37, %v2550_v21  ;;  %v242_v43 = vcombine.high %v234_v38, %v234_v38  ;;  %v1973_v47 = vld.sshfl [vmem:[#allocation2 + $0x10] sm:$0x13 pattern:$0x75316420]  ;;  %v286_v51 = vcombine.low %v2548_v19, %v234_v38  ;;  %v284_v52 = vrot.slane %v270_v44, %v2550_v21 }
 0x1e7   :  { %624 = vst.msk [vmem:[#allocation2 + $0x20] sm:$0xfc] %vm620_vm0, %v617_v35  ;;  %1607 = vst [vmem:[#allocation2 + $0x10] sm:$0xf] %v2269_v11  ;;  %v732_v55 = vcombine.high %v1973_v47, %v1973_v47  ;;  %v2625_v4 = vrot.slane %v1973_v47, %v2574_v41  ;;  %vm1579_vm14 = vcmask 59392   ;;  %vm1603_vm0 = vcmask 123968  }
 0x1e8   :  { %636 = vst.msk [vmem:[#allocation2 + $0x20] sm:$0xfe] %vm632_vm1, %v629_v24  ;;  %v287_v53 = vcombine.low %v242_v43, %v241_v42  ;;  %v243_v54 = vcombine.high %v241_v42, %v241_v42  ;;  %v285_v59 = vcombine.low %v277_v50, %v284_v52  ;;  %v294_v8 = vrot.slane %v286_v51, %v2550_v21  ;;  %v1637_v19 = vpop.permute.xlu0 %1636  ;;  %v1676_v50 = vld [vmem:[%s2924_s2 + $0x120] sm:$0xff]  ;;  %v1677_v51 = vld [vmem:[%s2924_s2 + $0x128] sm:$0xff] }
 0x1e9   :  { %646 = vst.msk [vmem:[#allocation2 + $0x20] sm:$0xff] %vm644_vm2, %v641_v49  ;;  %v1635_v0 = vpop.permute.xlu1 %1634  ;;  %v2633_v9 = vrot.slane %v732_v55, %v2574_v41  ;;  %v747_v22 = vcombine.high %v2625_v4, %v2625_v4  ;;  %v2203_v62 = vpack.c.bf16 %v1677_v51, %v1676_v50  ;;  %vm1858_vm1 = vcmask 189568  }
 0x1ea   :  { %1619 = vst.msk [vmem:[#allocation2 + $0x10] sm:$0xf] %vm137_vm5, %v1613_v48  ;;  %v301_v60 = vrot.slane %v287_v53, %v2550_v21  ;;  %v647_v32 = vld [vmem:[#allocation2] sm:$0xff]  ;;  %v2612_v1 = vcombine.low %v243_v54, %v2545_v17  ;;  %2078 = vmatmul.mubr.msk.f32.vlgmr.msra.gmra.mrb[0].mxu1 %vm356_vm7, %v285_v59  ;;  %v2200_v17 = vpack.c.bf16 %v2622_v3, %v2617_v2  ;;  %v1679_v2 = vld [vmem:[%s2924_s2 + $0x138] sm:$0xff]  ;;  %vm1871_vm2 = vcmask 195584  }
 0x1eb   :  { %1631 = vst.msk [vmem:[#allocation2 + $0x10] sm:$0x7] %vm1630_vm3, %v1623_v56  ;;  %v676_v6 = vcombine.high %v647_v32, %v647_v32  ;;  %v683_v7 = vrot.slane %v647_v32, %v2574_v41  ;;  %1605 = vst [vmem:[#allocation2] sm:$0xff] %v2269_v11  ;;  %2192 = vmatpush1.bf16.msra.mxu1 %v2191_v36  ;;  %2080 = vmatprep.mubr.msk.f32.mxu1 %vm2274_vm8, %v2269_v11 }
 0x1ec   :  { %1643 = vst.msk [vmem:[#allocation2 + $0x10] sm:$0x3] %vm1642_vm6, %v1635_v0  ;;  %2193 = vmatprep.subr.bf16.mxu1 %v2270_v23  ;;  %v302_v16 = vcombine.low %v294_v8, %v301_v60  ;;  %v310_v14 = vrot.slane %v2612_v1, %v2550_v21  ;;  %v919_v29 = vcombine.low %v2625_v4, %v2633_v9  ;;  %v1678_v9 = vld [vmem:[%s2924_s2 + $0x130] sm:$0xff] }
 0x1ed   :  { %v1974_v5 = vld.sshfl [vmem:[#allocation2 + $0x30] sm:$0x13 pattern:$0x75316420]  ;;  %1618 = vst.msk [vmem:[#allocation2] sm:$0xf0] %vm1617_vm9, %v1613_v48  ;;  %v690_v13 = vrot.slane %v676_v6, %v2574_v41  ;;  %v691_v15 = vcombine.high %v683_v7, %v683_v7  ;;  %v1647_v20 = vpop.permute.xlu1 %1646  ;;  %v699_v30 = vrot.slane %v683_v7, %v2574_v41 }
 0x1ee   :  { %1611 = vst [vmem:[#allocation2 + $0x30] sm:$0xf] %v2269_v11  ;;  %1629 = vst.msk [vmem:[#allocation2] sm:$0xf8] %vm1628_vm10, %v1623_v56  ;;  %v804_v24 = vcombine.high %v1974_v5, %v1974_v5  ;;  %v2655_v25 = vrot.slane %v1974_v5, %v2574_v41  ;;  %2081 = vmatmul.mubr.msk.f32.gmra.mrb[2].mxu1 %vm356_vm7, %v302_v16  ;;  %v929_v4 = vrot.slane %v919_v29, %v2574_v41 }
 0x1ef   :  { %1621 = vst.msk [vmem:[#allocation2 + $0x30] sm:$0xf] %vm137_vm5, %v1614_v58  ;;  %v692_v26 = vcombine.high %v690_v13, %v690_v13  ;;  %2195 = vmatpush1.bf16.msra.mxu1 %v2194_v10  ;;  %2083 = vmatprep.mubr.msk.f32.mxu1 %vm2274_vm8, %v2269_v11  ;;  %v706_v31 = vrot.slane %v690_v13, %v2574_v41  ;;  %vm570_vm5 = vcmask 64512  }
 0x1f0   :  { %1633 = vst.msk [vmem:[#allocation2 + $0x30] sm:$0x7] %vm1630_vm3, %v2565_v34  ;;  %v649_v18 = vld [vmem:[#allocation2 + $0x20] sm:$0xff]  ;;  %v713_v33 = vrot.slane %v691_v15, %v2574_v41  ;;  %2196 = vmatprep.subr.bf16.mxu1 %v2270_v23  ;;  %v818_v44 = vrot.slane %v804_v24, %v2574_v41  ;;  %v819_v45 = vcombine.high %v2655_v25, %v2655_v25  ;;  %vm1945_vm3 = vcmask 25600  }
 0x1f1   :  { %1641 = vst.msk [vmem:[#allocation2] sm:$0xfc] %vm1640_vm11, %v1635_v0  ;;  %v748_v27 = vcombine.high %v649_v18, %v649_v18  ;;  %v755_v28 = vrot.slane %v649_v18, %v2574_v41  ;;  %1609 = vst [vmem:[#allocation2 + $0x20] sm:$0xff] %v2269_v11  ;;  %v720_v39 = vrot.slane %v692_v26, %v2574_v41  ;;  %v1649_v40 = vpop.permute.xlu1 %1648 }
 0x1f2   :  { %1645 = vst.msk [vmem:[#allocation2 + $0x30] sm:$0x3] %vm1642_vm6, %v1637_v19  ;;  %v870_v42 = vcombine.low %v699_v30, %v713_v33  ;;  %v1975_v43 = vcombine.high %v699_v30, %v713_v33  ;;  %2084 = vmatmul.mubr.msk.f32.gmra.mrb[4].mxu1 %vm356_vm7, %v310_v14  ;;  %v970_v3 = vcombine.low %v818_v44, %v819_v45  ;;  %v1680_v14 = vld [vmem:[%s2924_s2 + $0x140] sm:$0xff]  ;;  %v1683_v33 = vld [vmem:[%s2924_s2 + $0x158] sm:$0xff] }
 0x1f3   :  { %1653 = vst.msk [vmem:[#allocation2] sm:$0xfe] %vm1652_vm12, %v1647_v20  ;;  %v762_v35 = vrot.slane %v748_v27, %v2574_v41  ;;  %v763_v37 = vcombine.high %v755_v28, %v755_v28  ;;  %v771_v38 = vrot.slane %v755_v28, %v2574_v41  ;;  %v872_v47 = vcombine.low %v706_v31, %v720_v39  ;;  %v1687_v44 = vld [vmem:[%s2924_s2 + $0x178] sm:$0xff] }
 0x1f4   :  { %1655 = vst.msk [vmem:[#allocation2 + $0x10] sm:$0x1] %vm1654_vm13, %v1647_v20  ;;  %1657 = vst.msk [vmem:[#allocation2 + $0x30] sm:$0x1] %vm1654_vm13, %v1649_v40  ;;  %v1976_v48 = vcombine.high %v706_v31, %v720_v39  ;;  %2198 = vmatpush1.bf16.msra.mxu1 %v2197_v12  ;;  %v880_v52 = vrot.slane %v870_v42, %v2574_v41  ;;  %v887_v53 = vrot.slane %v1975_v43, %v2574_v41  ;;  %v1682_v31 = vld [vmem:[%s2924_s2 + $0x150] sm:$0xff]  ;;  %v1684_v39 = vld [vmem:[%s2924_s2 + $0x160] sm:$0xff] }
 0x1f5   :  { %1620 = vst.msk [vmem:[#allocation2 + $0x20] sm:$0xf0] %vm1617_vm9, %v1614_v58  ;;  %v764_v46 = vcombine.high %v762_v35, %v762_v35  ;;  %v778_v49 = vrot.slane %v762_v35, %v2574_v41  ;;  %v785_v54 = vrot.slane %v763_v37, %v2574_v41  ;;  %2199 = vmatprep.subr.bf16.mxu1 %v2270_v23  ;;  %v1686_v43 = vld [vmem:[%s2924_s2 + $0x170] sm:$0xff] }
 0x1f6   :  { %1632 = vst.msk [vmem:[#allocation2 + $0x20] sm:$0xf8] %vm1628_vm10, %v2565_v34  ;;  %v1661_v34 = vld [vmem:[#allocation2 + $0x8] sm:$0xff]  ;;  %v894_v55 = vrot.slane %v872_v47, %v2574_v41  ;;  %v901_v56 = vrot.slane %v1976_v48, %v2574_v41  ;;  %v793_v36 = vcombine.high %v771_v38, %v771_v38  ;;  %v920_v57 = vcombine.low %v747_v22, %v771_v38  ;;  %v1667_v48 = vld [vmem:[#allocation2 + $0x38] sm:$0xf] }
 0x1f7   :  { %1644 = vst.msk [vmem:[#allocation2 + $0x20] sm:$0xfc] %vm1640_vm11, %v1637_v19  ;;  %1984 = vmatprep.mubr.msk.f32.mxu1 %vm134_vm4, %v1661_v34  ;;  %v902_v58 = vcombine.low %v880_v52, %v887_v53  ;;  %v795_v59 = vcombine.high %v785_v54, %v785_v54  ;;  %v792_v60 = vrot.slane %v764_v46, %v2574_v41  ;;  %v1681_v22 = vld [vmem:[%s2924_s2 + $0x148] sm:$0xff]  ;;  %v1663_v46 = vld [vmem:[#allocation2 + $0x18] sm:$0xf] }
 0x1f8   :  { %1656 = vst.msk [vmem:[#allocation2 + $0x20] sm:$0xfe] %vm1652_vm12, %v1649_v40  ;;  %v794_v61 = vcombine.high %v778_v49, %v778_v49  ;;  %v903_v63 = vcombine.low %v894_v55, %v901_v56  ;;  %v921_v32 = vcombine.low %v785_v54, %v793_v36  ;;  %v936_v0 = vrot.slane %v920_v57, %v2574_v41  ;;  %v1685_v40 = vld [vmem:[%s2924_s2 + $0x168] sm:$0xff]  ;;  %v1966_v36 = vld [vmem:[%s2925_s3] ss:$0 sm:$0xff] }
 0x1f9   :  { %2201 = vmatpush1.bf16.msra.mxu1 %v2200_v17  ;;  %v922_v1 = vcombine.low %v795_v59, %v778_v49  ;;  %v796_v5 = vcombine.high %v792_v60, %v792_v60  ;;  %v910_v7 = vrot.slane %v902_v58, %v2574_v41  ;;  %v2206_v17 = vpack.c.bf16 %v1679_v2, %v1678_v9  ;;  %v1665_v34 = vld [vmem:[#allocation2 + $0x28] sm:$0xff]  ;;  %v1972_v57 = vld [vmem:[%s2925_s3 + $0x1] ss:$0 sm:$0xff] }
 0x1fa   :  { %v968_v6 = vcombine.low %v792_v60, %v794_v61  ;;  %2202 = vmatprep.subr.bf16.mxu1 %v2270_v23  ;;  %v917_v8 = vrot.slane %v903_v63, %v2574_v41  ;;  %v943_v10 = vrot.slane %v921_v32, %v2574_v41  ;;  %v951_v13 = vcombine.low %v929_v4, %v936_v0  ;;  %v1660_v49 = vld [vmem:[#allocation2] sm:$0xff] }
 0x1fb   :  { %v950_v12 = vrot.slane %v922_v1, %v2574_v41  ;;  %v969_v15 = vcombine.low %v796_v5, %v2655_v25  ;;  %v991_v26 = vrot.slane %v970_v3, %v2574_v41  ;;  %v2209_v29 = vpack.c.bf16 %v1681_v22, %v1680_v14  ;;  %v1666_v47 = vld [vmem:[#allocation2 + $0x30] sm:$0xf] }
 0x1fc   :  { %v918_v16 = vcombine.low %v910_v7, %v917_v8  ;;  %v977_v19 = vrot.slane %v968_v6, %v2574_v41  ;;  %v959_v24 = vrot.slane %v951_v13, %v2574_v41  ;;  %v2212_v38 = vpack.c.bf16 %v1683_v33, %v1682_v31  ;;  %v1662_v53 = vld [vmem:[#allocation2 + $0x10] sm:$0xf] }
 0x1fd   :  { %2204 = vmatpush1.bf16.msra.mxu1 %v2203_v62  ;;  %v952_v18 = vcombine.low %v943_v10, %v950_v12  ;;  %v984_v20 = vrot.slane %v969_v15, %v2574_v41  ;;  %v1006_v35 = vrot.slane %v991_v26, %v2574_v41  ;;  %v2215_v42 = vpack.c.bf16 %v1685_v40, %v1684_v39 }
 0x1fe   :  { %2119 = vmatmul.mubr.f32.vlgmr.msra.gmra.mrb[2].mxu0 %v918_v16  ;;  %2205 = vmatprep.subr.bf16.mxu1 %v2270_v23  ;;  %v2218_v45 = vpack.c.bf16 %v1687_v44, %v1686_v43  ;;  %v1981_v50 = vcombine.low %v1663_v46, %v1665_v34  ;;  %v1706_v52 = vcombine.low %v1666_v47, %v1667_v48 }
 0x1ff   :  { %2121 = vmatprep.mubr.msk.f32.mxu0 %vm2274_vm8, %v2269_v11  ;;  %v966_v25 = vrot.slane %v952_v18, %v2574_v41  ;;  %v992_v27 = vcombine.low %v977_v19, %v984_v20  ;;  %v1664_v51 = vld [vmem:[#allocation2 + $0x20] sm:$0xff]  ;;  %v252_v58 = vcombine.high %v1966_v36, %v1966_v36  ;;  %v821_v59 = vcombine.high %v1972_v57, %v1972_v57 }
 0x200   :  { %v1980_v54 = vcombine.low %v1662_v53, %v1664_v51  ;;  %v1705_v55 = vcombine.high %v1664_v51, %v1665_v34  ;;  %v1983_v56 = vcombine.high %v1665_v34, %v1706_v52  ;;  %v259_v60 = vrot.slane %v1966_v36, %v2550_v21 }
 0x201   :  { %2207 = vmatpush1.bf16.msra.mxu1 %v2206_v17  ;;  %v967_v28 = vcombine.low %v959_v24, %v966_v25  ;;  %v999_v30 = vrot.slane %v992_v27, %v2574_v41  ;;  %v266_v61 = vrot.slane %v252_v58, %v2550_v21  ;;  %v828_v62 = vrot.slane %v1972_v57, %v2574_v41 }
 0x202   :  { %2208 = vmatprep.subr.bf16.mxu1 %v2270_v23  ;;  %v835_v63 = vrot.slane %v821_v59, %v2574_v41  ;;  %v267_v32 = vcombine.high %v259_v60, %v259_v60  ;;  %v328_v12 = vcombine.low %v259_v60, %v259_v60 }
 0x203   :  { %2122 = vmatmul.mubr.f32.gmra.mrb[4].mxu0 %v967_v28  ;;  %v1007_v37 = vcombine.low %v999_v30, %v1006_v35  ;;  %v268_v0 = vcombine.high %v266_v61, %v266_v61  ;;  %v836_v1 = vcombine.high %v828_v62, %v828_v62  ;;  %v844_v7 = vrot.slane %v828_v62, %v2574_v41 }
 0x204   :  { %2124 = vmatprep.mubr.msk.f32.mxu0 %vm2274_vm8, %v2269_v11  ;;  %v837_v4 = vcombine.high %v835_v63, %v835_v63  ;;  %v311_v5 = vcombine.low %v259_v60, %v267_v32  ;;  %v851_v9 = vrot.slane %v835_v63, %v2574_v41  ;;  %v329_v13 = vcombine.low %v267_v32, %v266_v61 }
 0x205   :  { %2210 = vmatpush1.bf16.msra.mxu1 %v2209_v29  ;;  %v312_v6 = vcombine.low %v266_v61, %v268_v0  ;;  %v858_v8 = vrot.slane %v836_v1, %v2574_v41  ;;  %v336_v20 = vrot.slane %v328_v12, %v2550_v21  ;;  %v866_v27 = vcombine.high %v844_v7, %v844_v7 }
 0x206   :  { %2211 = vmatprep.subr.bf16.mxu1 %v2270_v23  ;;  %v865_v2 = vrot.slane %v837_v4, %v2574_v41  ;;  %v319_v3 = vrot.slane %v311_v5, %v2550_v21  ;;  %v343_v14 = vrot.slane %v329_v13, %v2550_v21  ;;  %v345_v30 = vcombine.low %v268_v0, %v259_v60 }
 0x207   :  { %2125 = vmatmul.mubr.f32.gmra.mrb[6].mxu0 %v1007_v37  ;;  %v326_v10 = vrot.slane %v312_v6, %v2550_v21  ;;  %v1011_v15 = vcombine.low %v844_v7, %v858_v8  ;;  %v1977_v16 = vcombine.high %v844_v7, %v858_v8  ;;  %v868_v28 = vcombine.high %v858_v8, %v858_v8 }
 0x208   :  { %2133 = vmatprep.mubr.msk.f32.mxu0 %vm2274_vm8, %v2269_v11  ;;  %v1013_v17 = vcombine.low %v851_v9, %v865_v2  ;;  %v1978_v18 = vcombine.high %v851_v9, %v865_v2  ;;  %v344_v35 = vcombine.low %v336_v20, %v343_v14  ;;  %v1060_v39 = vcombine.low %v866_v27, %v844_v7 }
 0x209   :  { %2213 = vmatpush1.bf16.msra.mxu1 %v2212_v38  ;;  %v327_v19 = vcombine.low %v319_v3, %v326_v10  ;;  %v2779_v22 = vrot.slane %v1011_v15, %v2574_v41  ;;  %v1028_v24 = vrot.slane %v1977_v16, %v2574_v41  ;;  %v1061_v40 = vcombine.low %v858_v8, %v866_v27 }
 0x20a   :  { %2214 = vmatprep.subr.bf16.mxu1 %v2270_v23  ;;  %v1035_v25 = vrot.slane %v1013_v17, %v2574_v41  ;;  %v1042_v26 = vrot.slane %v1978_v18, %v2574_v41  ;;  %v352_v46 = vrot.slane %v345_v30, %v2550_v21  ;;  %v867_v34 = vcombine.high %v851_v9, %v851_v9 }
 0x20b   :  { %v1043_v37 = vcombine.low %v2779_v22, %v1028_v24  ;;  %vm1834_vm8 = vcmask 60416  }
 0x20c   :  { %v1044_v38 = vcombine.low %v1035_v25, %v1042_v26  ;;  %v1101_v62 = vcombine.low %v865_v2, %v867_v34 }
 0x20d   :  { %2216 = vmatpush1.bf16.msra.mxu1 %v2215_v42  ;;  %v1062_v42 = vcombine.low %v868_v28, %v851_v9  ;;  %v1051_v52 = vrot.slane %v1043_v37, %v2574_v41 }
 0x20e   :  { %2217 = vmatprep.subr.bf16.mxu1 %v2270_v23  ;;  %v1982_v23 = vcombine.low %v1705_v55, %v1666_v47  ;;  %v869_v47 = vcombine.high %v865_v2, %v865_v2  ;;  %v1058_v53 = vrot.slane %v1044_v38, %v2574_v41  ;;  %v2792_v55 = vrot.slane %v1061_v40, %v2574_v41 }
 0x210   :  { %v1102_v63 = vcombine.low %v869_v47, %v844_v7  ;;  %v1109_v7 = vrot.slane %v1101_v62, %v2574_v41  ;;  %v1059_v26 = vcombine.low %v1051_v52, %v1058_v53 }
 0x211   :  { %2219 = vmatpush1.bf16.msra.mxu1 %v2218_v45 }
 0x212   :  { %v1116_v16 = vrot.slane %v1102_v63, %v2574_v41 }
 0x214   :  { %1795 = vmatmul.mubr.f32.vlgmr.msra.gmra.mrb[6].mxu1 %v1660_v49 }
 0x215   :  { %1985 = vmatprep.mubr.msk.f32.mxu1 %vm134_vm4, %v1981_v50 }
 0x218   :  { %1800 = vmatmul.mubr.f32.gmra.mrb[8].mxu1 %v1980_v54  ;;  %v1069_v54 = vrot.slane %v1060_v39, %v2574_v41 }
 0x219   :  { %1986 = vmatprep.mubr.msk.f32.mxu1 %vm134_vm4, %v1983_v56  ;;  %v1083_v56 = vrot.slane %v1062_v42, %v2574_v41  ;;  %vm572_vm4 = vcmask 58368  }
 0x21a   :  { %v1084_v9 = vcombine.low %v2779_v22, %v1069_v54 }
 0x21b   :  { %v1085_v3 = vcombine.low %v2792_v55, %v1083_v56 }
 0x21c   :  { %1805 = vmatmul.mubr.f32.gmra.mrb[10].mxu1 %v1982_v23  ;;  %v1092_v27 = vrot.slane %v1084_v9, %v2574_v41 }
 0x21d   :  { %v1099_v28 = vrot.slane %v1085_v3, %v2574_v41 }
 0x2bd   :  { %v429_v29 = vpop.f32.mrb[0].mxu1 }
 0x2be   :  { %v430_v31 = vadd.f32 %v429_v29, %v327_v19  ;;  %v2079_v33 = vpop.f32.mrb[1].mxu1 }
 0x2bf   :  { %v2810_v33 = vld [vmem:[%s2925_s3 + $0x2] ss:$0 sm:$0xff] }
 0x2c0   :  { %v446_v43 = vcombine.high %v430_v31, %v430_v31  ;;  %v453_v44 = vrot.slane %v430_v31, %v2550_v21  ;;  %v1117_v31 = vcombine.low %v1109_v7, %v1116_v16 }
 0x2c1   :  { %v434_v45 = vpop.f32.mrb[2].mxu1 }
 0x2c2   :  { %v460_v48 = vrot.slane %v446_v43, %v2550_v21  ;;  %v461_v49 = vcombine.high %v453_v44, %v453_v44  ;;  %v435_v50 = vadd.f32 %v434_v45, %v344_v35  ;;  %v2082_v51 = vpop.f32.mrb[3].mxu1  ;;  %v498_v36 = vmax.f32 %v453_v44, 0.0 }
 0x2c3   :  { %v1124_v47 = vrot.slane %v1117_v31, %v2574_v41 }
 0x2c4   :  { %v462_v23 = vcombine.high %v460_v48, %v460_v48  ;;  %v499_v57 = vmax.f32 %v461_v49, 0.0  ;;  %v463_v58 = vcombine.high %v435_v50, %v435_v50  ;;  %v500_v59 = vmax.f32 %v460_v48, 0.0 }
 0x2c5   :  { %v470_v60 = vrot.slane %v435_v50, %v2550_v21  ;;  %v439_v61 = vpop.f32.mrb[4].mxu1  ;;  %v1131_v48 = vrot.slane %v2792_v55, %v2574_v41  ;;  %v2822_v49 = vcombine.high %v2810_v33, %v2810_v33 }
 0x2c6   :  { %v501_v32 = vmax.f32 %v462_v23, 0.0  ;;  %v518_v0 = vcombine.low %v498_v36, %v499_v57  ;;  %v477_v1 = vrot.slane %v463_v58, %v2550_v21  ;;  %v440_v4 = vadd.f32 %v439_v61, %v352_v46  ;;  %v2085_v5 = vpop.f32.mrb[5].mxu1 }
 0x2c7   :  { %v478_v6 = vcombine.high %v470_v60, %v470_v60  ;;  %v502_v8 = vmax.f32 %v470_v60, 0.0  ;;  %v1100_v46 = vcombine.low %v1092_v27, %v1099_v28  ;;  %v1718_v60 = vcombine.low %v2810_v33, %v2822_v49 }
 0x2c8   :  { %v519_v10 = vcombine.low %v500_v59, %v501_v32  ;;  %v479_v12 = vcombine.high %v477_v1, %v477_v1  ;;  %v504_v13 = vmax.f32 %v477_v1, 0.0  ;;  %v486_v2 = vrot.slane %v440_v4, %v2550_v21 }
 0x2c9   :  { %v503_v15 = vmax.f32 %v478_v6, 0.0  ;;  %v526_v17 = vrot.slane %v518_v0, %v2550_v21  ;;  %v541_v20 = vrot.slane %v502_v8, %v2550_v21  ;;  %v1132_v59 = vcombine.low %v1124_v47, %v1131_v48 }
 0x2ca   :  { %v533_v18 = vrot.slane %v519_v10, %v2550_v21  ;;  %v505_v19 = vmax.f32 %v479_v12, 0.0  ;;  %v487_v22 = vcombine.high %v486_v2, %v486_v2  ;;  %v506_v24 = vmax.f32 %v486_v2, 0.0 }
 0x2cb   :  { %v542_v14 = vcombine.low %v503_v15, %v504_v13  ;;  %v573_v37 = vsel %vm572_vm4, %v541_v20, -inf  ;;  %v1719_v61 = vcombine.low %v2810_v33, %v2810_v33 }
 0x2cc   :  { %v534_v25 = vcombine.low %v526_v17, %v533_v18  ;;  %v507_v29 = vmax.f32 %v487_v22, 0.0  ;;  %v543_v30 = vcombine.low %v505_v19, %v506_v24 }
 0x2cd   :  { %v550_v38 = vrot.slane %v542_v14, %v2550_v21 }
 0x2ce   :  { %v571_v35 = vsel %vm570_vm5, %v534_v25, -inf  ;;  %v557_v39 = vrot.slane %v543_v30, %v2550_v21  ;;  %v565_v40 = vrot.slane %v507_v29, %v2550_v21 }
 0x2cf   :  { %v574_v43 = vmax.f32 %v571_v35, %v573_v37  ;;  %v1720_v37 = vcombine.low %v2822_v49, %v2810_v33 }
 0x2d0   :  { %v558_v34 = vcombine.low %v550_v38, %v557_v39  ;;  %v582_v53 = vsel %vm572_vm4, %v565_v40, -inf }
 0x2d1   :  { %v1202_v42 = vpop.f32.mrb[2].mxu0  ;;  %v575_v52 = vrot.slane %v574_v43, 4 }
 0x2d2   :  { %v1203_v44 = vadd.f32 %v1202_v42, %v1059_v26  ;;  %v2120_v45 = vpop.f32.mrb[3].mxu0  ;;  %v581_v21 = vsel %vm570_vm5, %v558_v34, -inf }
 0x2d3   :  { %v2829_v57 = vmax.f32 %v581_v21, %v582_v53  ;;  %v576_v6 = vmax.f32 %v574_v43, %v575_v52 }
 0x2d4   :  { %v1219_v50 = vcombine.high %v1203_v44, %v1203_v44  ;;  %v1226_v51 = vrot.slane %v1203_v44, %v2574_v41 }
 0x2d5   :  { %v577_v42 = vrot.slane %v576_v6, 2 }
 0x2d6   :  { %v1233_v54 = vrot.slane %v1219_v50, %v2574_v41  ;;  %v1234_v56 = vcombine.high %v1226_v51, %v1226_v51  ;;  %v1242_v23 = vrot.slane %v1226_v51, %v2574_v41  ;;  %v1207_v36 = vpop.f32.mrb[4].mxu0 }
 0x2d7   :  { %v1208_v55 = vadd.f32 %v1207_v36, %v1100_v46  ;;  %v2123_v58 = vpop.f32.mrb[5].mxu0  ;;  %v2850_v36 = vmax.f32 %v576_v6, %v577_v42 }
 0x2d8   :  { %v1235_v62 = vcombine.high %v1233_v54, %v1233_v54  ;;  %v1249_v63 = vrot.slane %v1233_v54, %v2574_v41  ;;  %v1256_v32 = vrot.slane %v1234_v56, %v2574_v41  ;;  %v1264_v0 = vcombine.high %v1242_v23, %v1242_v23 }
 0x2d9   :  { %v1386_v1 = vmax.f32 %v1242_v23, 0.0  ;;  %v1268_v4 = vcombine.high %v1208_v55, %v1208_v55  ;;  %v1275_v5 = vrot.slane %v1208_v55, %v2574_v41 }
 0x2da   :  { %v1263_v8 = vrot.slane %v1235_v62, %v2574_v41  ;;  %v1265_v9 = vcombine.high %v1249_v63, %v1249_v63  ;;  %v1266_v3 = vcombine.high %v1256_v32, %v1256_v32  ;;  %v1387_v10 = vmax.f32 %v1256_v32, 0.0  ;;  %v1212_v12 = vpop.f32.mrb[6].mxu0 }
 0x2db   :  { %v1388_v13 = vmax.f32 %v1264_v0, 0.0  ;;  %v1390_v15 = vmax.f32 %v1249_v63, 0.0  ;;  %v1282_v2 = vrot.slane %v1268_v4, %v2574_v41  ;;  %v1283_v7 = vcombine.high %v1275_v5, %v1275_v5  ;;  %v2126_v16 = vpop.f32.mrb[7].mxu0 }
 0x2dc   :  { %v1267_v17 = vcombine.high %v1263_v8, %v1263_v8  ;;  %v1389_v18 = vmax.f32 %v1266_v3, 0.0  ;;  %v1391_v19 = vmax.f32 %v1263_v8, 0.0  ;;  %v1392_v20 = vmax.f32 %v1265_v9, 0.0 }
 0x2dd   :  { %v1430_v14 = vcombine.low %v1386_v1, %v1387_v10  ;;  %v1284_v22 = vcombine.high %v1282_v2, %v1282_v2  ;;  %v1291_v24 = vrot.slane %v1275_v5, %v2574_v41  ;;  %v1298_v25 = vrot.slane %v1282_v2, %v2574_v41 }
 0x2de   :  { %v1393_v26 = vmax.f32 %v1267_v17, 0.0  ;;  %v1431_v27 = vcombine.low %v1388_v13, %v1389_v18  ;;  %v1432_v28 = vcombine.low %v1390_v15, %v1391_v19  ;;  %v1305_v29 = vrot.slane %v1283_v7, %v2574_v41 }
 0x2df   :  { %v1312_v30 = vrot.slane %v1284_v22, %v2574_v41  ;;  %v1313_v31 = vcombine.high %v1291_v24, %v1291_v24  ;;  %v1314_v35 = vcombine.high %v1298_v25, %v1298_v25  ;;  %v1440_v43 = vrot.slane %v1430_v14, %v2574_v41 }
 0x2e0   :  { %v1433_v38 = vcombine.low %v1392_v20, %v1393_v26  ;;  %v1447_v39 = vrot.slane %v1431_v27, %v2574_v41  ;;  %v1315_v40 = vcombine.high %v1305_v29, %v1305_v29  ;;  %v1394_v44 = vmax.f32 %v1291_v24, 0.0 }
 0x2e1   :  { %v1395_v45 = vmax.f32 %v1305_v29, 0.0  ;;  %v1396_v46 = vmax.f32 %v1313_v31, 0.0  ;;  %v1454_v34 = vrot.slane %v1432_v28, %v2574_v41  ;;  %v1398_v50 = vmax.f32 %v1298_v25, 0.0 }
 0x2e2   :  { %v1461_v47 = vrot.slane %v1433_v38, %v2574_v41  ;;  %v1397_v48 = vmax.f32 %v1315_v40, 0.0  ;;  %v1462_v51 = vcombine.low %v1440_v43, %v1447_v39  ;;  %v1399_v52 = vmax.f32 %v1312_v30, 0.0 }
 0x2e3   :  { %v1400_v21 = vmax.f32 %v1314_v35, 0.0  ;;  %v1479_v53 = vcombine.low %v1394_v44, %v1395_v45  ;;  %v1213_v23 = vadd.f32 %v1212_v12, %v1132_v59  ;;  %v1316_v55 = vcombine.high %v1312_v30, %v1312_v30 }
 0x2e4   :  { %v1463_v54 = vcombine.low %v1454_v34, %v1461_v47  ;;  %v1502_v56 = vcombine.low %v1397_v48, %v1398_v50  ;;  %v1493_v62 = vrot.slane %v1396_v46, %v2574_v41  ;;  %v1470_v5 = vrot.slane %v1462_v51, %v2574_v41 }
 0x2e5   :  { %v1486_v58 = vrot.slane %v1479_v53, %v2574_v41  ;;  %v1503_v63 = vcombine.low %v1399_v52, %v1400_v21  ;;  %v1317_v1 = vcombine.high %v1213_v23, %v1213_v23  ;;  %v1324_v4 = vrot.slane %v1213_v23, %v2574_v41 }
 0x2e6   :  { %v1477_v32 = vrot.slane %v1463_v54, %v2574_v41  ;;  %v1512_v0 = vrot.slane %v1502_v56, %v2574_v41  ;;  %v584_v9 = vrot.slane %v2829_v57, 4  ;;  %v1401_v16 = vmax.f32 %v1316_v55, 0.0 }
 0x2e7   :  { %v1494_v59 = vcombine.low %v1486_v58, %v1493_v62  ;;  %v1519_v6 = vrot.slane %v1503_v63, %v2574_v41  ;;  %v1796_v8 = vpop.f32.mrb[6].mxu1  ;;  %v1331_v3 = vrot.slane %v1317_v1, %v2574_v41  ;;  %v1332_v10 = vcombine.high %v1324_v4, %v1324_v4 }
 0x2e8   :  { %v1340_v12 = vrot.slane %v1324_v4, %v2574_v41  ;;  %v1797_v13 = vadd.f32 %v1796_v8, %v1718_v60  ;;  %v1798_v15 = vpop.f32.mrb[7].mxu1  ;;  %v1478_v17 = vcombine.low %v1470_v5, %v1477_v32  ;;  %v585_v27 = vmax.f32 %v2829_v57, %v584_v9 }
 0x2e9   :  { %v1501_v2 = vrot.slane %v1494_v59, %v2574_v41  ;;  %v1534_v7 = vcombine.low %v1512_v0, %v1519_v6  ;;  %v1333_v18 = vcombine.high %v1331_v3, %v1331_v3  ;;  %v1347_v19 = vrot.slane %v1331_v3, %v2574_v41 }
 0x2ea   :  { %v1354_v20 = vrot.slane %v1332_v10, %v2574_v41  ;;  %v1362_v14 = vcombine.high %v1340_v12, %v1340_v12  ;;  %v1402_v24 = vmax.f32 %v1340_v12, 0.0  ;;  %v1813_v25 = vcombine.high %v1797_v13, %v1797_v13 }
 0x2eb   :  { %v1542_v22 = vrot.slane %v1534_v7, %v2574_v41  ;;  %v1801_v26 = vpop.f32.mrb[8].mxu1  ;;  %v1361_v60 = vrot.slane %v1333_v18, %v2574_v41  ;;  %v1819_v38 = vmax.f32 %v1797_v13, 0.0  ;;  %v1406_v43 = vmax.f32 %v1347_v19, 0.0 }
 0x2ec   :  { %v1363_v28 = vcombine.high %v1354_v20, %v1354_v20  ;;  %v1403_v29 = vmax.f32 %v1354_v20, 0.0  ;;  %v1404_v30 = vmax.f32 %v1362_v14, 0.0  ;;  %v1803_v31 = vpop.f32.mrb[9].mxu1  ;;  %v1504_v35 = vcombine.low %v1401_v16, %v1402_v24 }
 0x2ed   :  { %v1820_v39 = vmax.f32 %v1813_v25, 0.0  ;;  %v1802_v40 = vadd.f32 %v1801_v26, %v1719_v61  ;;  %v1407_v44 = vmax.f32 %v1361_v60, 0.0  ;;  %v1578_v61 = vsel %vm570_vm5, %v1478_v17, -inf  ;;  %v1862_v60 = vld [vmem:[%s2926_s4 + $0x8] sm:$0xff] }
 0x2ee   :  { %v1405_v42 = vmax.f32 %v1363_v28, 0.0  ;;  %v1505_v45 = vcombine.low %v1403_v29, %v1404_v30  ;;  %v1526_v46 = vrot.slane %v1504_v35, %v2574_v41  ;;  %v1580_v23 = vsel %vm1579_vm14, %v1501_v2, -inf }
 0x2ef   :  { %v1829_v57 = vcombine.low %v1819_v38, %v1820_v39  ;;  %v1814_v34 = vcombine.high %v1802_v40, %v1802_v40  ;;  %v1821_v47 = vmax.f32 %v1802_v40, 0.0  ;;  %v1806_v48 = vpop.f32.mrb[10].mxu1  ;;  %v1565_v53 = vrot.slane %v1407_v44, %v2574_v41  ;;  %v1863_v39 = vld [vmem:[%s2926_s4 + $0x10] sm:$0xff] }
 0x2f0   :  { %v1533_v50 = vrot.slane %v1505_v45, %v2574_v41  ;;  %v1551_v51 = vcombine.low %v1405_v42, %v1406_v43  ;;  %v1807_v52 = vadd.f32 %v1806_v48, %v1720_v37  ;;  %v1808_v21 = vpop.f32.mrb[11].mxu1  ;;  %v1581_v33 = vmax.f32 %v1578_v61, %v1580_v23  ;;  %v1987_v61 = vld [vmem:[%s2927_s5] ss:$0 sm:$0xff] }
 0x2f1   :  { %v1833_v54 = vsel %vm570_vm5, %v1829_v57, -inf  ;;  %v1835_v56 = vsel %vm1834_vm8, %v1821_v47, -inf  ;;  %v1822_v32 = vmax.f32 %v1814_v34, 0.0  ;;  %v586_v49 = vrot.slane %v585_v27, 2 }
 0x2f2   :  { %v1535_v55 = vcombine.low %v1526_v46, %v1533_v50  ;;  %v1558_v58 = vrot.slane %v1551_v51, %v2574_v41  ;;  %v1836_v62 = vmax.f32 %v1833_v54, %v1835_v56  ;;  %v1815_v63 = vcombine.high %v1807_v52, %v1807_v52 }
 0x2f3   :  { %v1823_v0 = vmax.f32 %v1807_v52, 0.0  ;;  %v1582_v6 = vrot.slane %v1581_v33, 4  ;;  %v579_v8 = vrot.slane %v2850_v36, 1  ;;  %v587_v9 = vmax.f32 %v585_v27, %v586_v49  ;;  %v1861_v27 = vld [vmem:[%s2926_s4] sm:$0xff] }
 0x2f4   :  { %v1549_v37 = vrot.slane %v1535_v55, %v2574_v41  ;;  %v1566_v1 = vcombine.low %v1558_v58, %v1565_v53  ;;  %v1837_v4 = vrot.slane %v1836_v62, 4  ;;  %v1824_v5 = vmax.f32 %v1815_v63, 0.0 }
 0x2f5   :  { %v1830_v59 = vcombine.low %v1822_v32, %v1823_v0  ;;  %v1583_v2 = vmax.f32 %v1581_v33, %v1582_v6  ;;  %v588_v7 = vrot.slane %v587_v9, 1  ;;  %v580_v24 = vmax.f32 %v2850_v36, %v579_v8 }
 0x2f6   :  { %v1573_v3 = vrot.slane %v1566_v1, %v2574_v41  ;;  %v1838_v10 = vmax.f32 %v1836_v62, %v1837_v4  ;;  %v1844_v12 = vsel %vm1834_vm8, %v1824_v5, -inf  ;;  %v1550_v13 = vcombine.low %v1542_v22, %v1549_v37 }
 0x2f7   :  { %v1843_v15 = vsel %vm570_vm5, %v1830_v59, -inf  ;;  %v1584_v20 = vrot.slane %v1583_v2, 2  ;;  %v589_v41 = vmax.f32 %v587_v9, %v588_v7  ;;  %v2221_v30 = vpack.c.bf16 %v1862_v60, %v1861_v27 }
 0x2f8   :  { %v1839_v16 = vrot.slane %v1838_v10, 2  ;;  %v1845_v17 = vmax.f32 %v1843_v15, %v1844_v12  ;;  %v1588_v18 = vsel %vm570_vm5, %v1550_v13, -inf  ;;  %v1589_v19 = vsel %vm1579_vm14, %v1573_v3, -inf }
 0x2f9   :  { %v1590_v14 = vmax.f32 %v1588_v18, %v1589_v19  ;;  %v593_v22 = vsel %vm592_vm15, %v589_v41, %v580_v24  ;;  %v1585_v31 = vmax.f32 %v1583_v2, %v1584_v20  ;;  %2222 = vmatpush3.bf16.msra.mxu0 %v2221_v30 }
 0x2fa   :  { %v1846_v25 = vrot.slane %v1845_v17, 4  ;;  %v1840_v29 = vmax.f32 %v1838_v10, %v1839_v16  ;;  %595 = vst.msk [vmem:[#allocation3] sm:$0x3] %vm572_vm4, %v593_v22  ;;  %2131 = vmatprep.subr.mxu0 %v2269_v11 }
 0x2fb   :  { %v1591_v26 = vrot.slane %v1590_v14, 4  ;;  %v1586_v43 = vrot.slane %v1585_v31, 1 }
 0x2fc   :  { %v1847_v28 = vmax.f32 %v1845_v17, %v1846_v25  ;;  %v1841_v40 = vrot.slane %v1840_v29, 1 }
 0x2fd   :  { %v1592_v36 = vmax.f32 %v1590_v14, %v1591_v26  ;;  %2132 = vmatpush3.msra.mxu0 %v1863_v39  ;;  %v1587_v47 = vmax.f32 %v1585_v31, %v1586_v43 }
 0x2fe   :  { %v1848_v35 = vrot.slane %v1847_v28, 2  ;;  %v1842_v57 = vmax.f32 %v1840_v29, %v1841_v40 }
 0x2ff   :  { %v1593_v38 = vrot.slane %v1592_v36, 2 }
 0x300   :  { %v1849_v42 = vmax.f32 %v1847_v28, %v1848_v35 }
 0x301   :  { %v1594_v44 = vmax.f32 %v1592_v36, %v1593_v38 }
 0x302   :  { %v1850_v45 = vrot.slane %v1849_v42, 1 }
 0x303   :  { %v1595_v46 = vrot.slane %v1594_v44, 1 }
 0x304   :  { %v1851_v34 = vmax.f32 %v1849_v42, %v1850_v45 }
 0x305   :  { %v1596_v48 = vmax.f32 %v1594_v44, %v1595_v46 }
 0x306   :  { %v1854_v50 = vsel %vm592_vm15, %v1851_v34, %v1842_v57 }
 0x307   :  { %v1599_v51 = vsel %vm592_vm15, %v1596_v48, %v1587_v47  ;;  %1855 = vrot.lane.b32.xlu1 %v1854_v50, %s2277_s19 }
 0x308   :  { %1600 = vrot.lane.b32.xlu0 %v1599_v51, %s2278_s20 }
 0x379   :  { %v1856_v11 = vpop.permute.xlu1 %1855 }
 0x37a   :  { %v1601_v52 = vpop.permute.xlu0 %1600 }
 0x37b   :  { %1604 = vst.msk [vmem:[#allocation3] sm:$0x3] %vm1603_vm0, %v1601_v52 }
 0x37c   :  { %1859 = vst.msk [vmem:[#allocation3] sm:$0x3] %vm1858_vm1, %v1856_v11 }
 0x383   :  { %v1860_v21 = vld [vmem:[#allocation3] sm:$0x3] }
 0x384   :  { %2134 = vmatmul.mubr.msk.f32.vlgmr.msra.gmra.mrb[8].mxu0 %vm1871_vm2, %v1860_v21 }
 0x457   :  { %v1941_v53 = vpop.f32.mrb[8].mxu0 }
 0x458   :  { %v1942_v54 = vadd.f32 %v1987_v61, %v1941_v53  ;;  %v2135_v56 = vpop.f32.mrb[9].mxu0 }
 0x45a   :  { %1946 = vst.msk [vmem:[#allocation4] sm:$0x3] %vm1945_vm3, %v1942_v54 }
 0x45b   :  { %2255 = shalt.err (!%p2252_p4)
}
 0x45c   :  { %s2256_s26 = scalar_lea.hbm %s2928_s6, 32 }
 0x45d   :  { %p2257_p5 = scmp.ne.s32.totalorder %s2928_s6, %s2256_s26  ;;  %p2260_p6 = scmp.lt.u32.totalorder %s2256_s26, %s2928_s6 }
 0x45f   :  { %p2262_p7 = pnand %p2260_p6, %p2257_p5 }
 0x461   :  { %2265 = shalt.err (!%p2262_p7)
}
 0x462   :  { %1956 = dma.vmem_to_hbm [thread:$0]  %s1954_s22, 32, %s2928_s6, [#allocation5]  }
 0x463   :  { %2266 = dma.done.wait [#allocation5], 32  }
 0x464   :  { %2267 = vsyncadd [#allocation5], 4294967264 }
 0x465   :  { %1960 = vsyncpa [#allocation5], 1 }

</bundles_post_ra>
